<compile_context>
chip_gen: v5e
topology: v5e:2x2
jax: 0.10.0
libtpu: 0.0.40
codegen_flags: <defaults>
</compile_context>

<pallas_src>
import functools

import jax
import jax.numpy as jnp
from jax.experimental import pallas as pl
from jax.experimental.pallas import tpu as pltpu


# ---------------------------------------------------------------------------
# Kernel
# ---------------------------------------------------------------------------
def _perturb_kernel(scal_ref, x_ref, *out_refs, n_sel, compute_xp):
    """One (tile_r, cols) elementwise tile.

    scal_ref: SMEM (3 + 2*n_sel,) f32 =
              [perturb_w, base_scale, base_bias, s_0, b_0, s_1, b_1, ...]
    x_ref:    VMEM tile, input image values in [-1, 1]
    out_refs: (out_ref,) or (out_ref, xp_ref)
    """
    out_ref = out_refs[0]
    x = x_ref[...].astype(jnp.float32)
    # base_perturb (affine + clamp to [0, 1]) on the [0, 1]-rescaled image.
    base = jnp.clip((x * 0.5 + 0.5) * scal_ref[1] + scal_ref[2], 0.0, 1.0)
    # The module returns the base-perturbed image mapped back to [-1, 1].
    out_ref[...] = (base * 2.0 - 1.0).astype(out_ref.dtype)

    if compute_xp:
        xp_ref = out_refs[1]
        w = scal_ref[0]
        xp = base                                # x_perturbed = x * 1.0
        for k in range(n_sel):                   # static unroll over selected perturbs
            s = scal_ref[3 + 2 * k]
            b = scal_ref[4 + 2 * k]
            xc = jnp.clip(xp * s + b, 0.0, 1.0)
            xp = w * xc + (1.0 - w) * xp         # exact PyTorch lerp form
        xp_ref[...] = xp.astype(xp_ref.dtype)


# ---------------------------------------------------------------------------
# Host-side tiling helpers
# ---------------------------------------------------------------------------
def _cdiv(a, b):
    return -(-a // b)


def _sublane_multiple(itemsize):
    # 8 rows per 32-bit sublane group; sub-32-bit dtypes pack along sublanes
    # (16 rows for bf16, 32 for int8/fp8) -> keeps stores fully packed.
    return 8 * max(1, 4 // max(1, int(itemsize)))


def _vmem_budget_bytes():
    """~75% of this chip's VMEM: 48 MiB on v7x, 96 MiB on v5e/v6e."""
    try:
        cap = int(pltpu.get_tpu_info().vmem_capacity_bytes)
    except Exception:
        cap = 64 << 20              # conservative fallback: v7x per-TC VMEM
    return min((cap * 3) // 4, 96 << 20)


def _pick_2d_view(total):
    """Pad-free lane-dense 2D view: cols a multiple of 128 dividing `total`."""
    for cols in (4096, 2048, 1024, 512, 256, 128):
        if total % cols == 0:
            return total // cols, cols
    return None


def _pick_tile_rows(rows, cols, itemsize, n_streams, vmem_budget):
    """Rows per block: dtype-aware ~8 MiB target, budgeted so all
    double-buffered streams fit `vmem_budget`, >= 4 (even) grid steps when
    rows permit (v7x 2-TC split + per-TC DMA overlap)."""
    sub = _sublane_multiple(itemsize)
    if rows <= sub:
        return rows                              # single full-extent block
    row_bytes = cols * itemsize
    tile_bytes = min(8 << 20, vmem_budget // (2 * n_streams))
    tile_r = max(sub, (tile_bytes // row_bytes) // sub * sub)
    if rows >= 4 * sub:
        # cap so there are >= 4 grid steps (rounded up to the sublane multiple
        # so the count lands on 4, an even number, in the common case)
        cap4 = _cdiv(_cdiv(rows, 4), sub) * sub
        tile_r = min(tile_r, cap4)
    if tile_r >= rows:
        return rows
    # best-effort nudge to an even grid-step count without shrinking the tile
    # below half its size
    g = _cdiv(rows, tile_r)
    if g > 1 and g % 2 == 1:
        t, floor = tile_r - sub, max(sub, tile_r // 2)
        while t >= floor:
            if _cdiv(rows, t) % 2 == 0:
                tile_r = t
                break
            t -= sub
    return tile_r


# ---------------------------------------------------------------------------
# pallas_call wrapper on a lane-dense 2D view
# ---------------------------------------------------------------------------
def _run_pallas_2d(scal, x2d, n_sel, return_perturbed, donate_x):
    rows, cols = x2d.shape
    dt = x2d.dtype
    n_streams = 3 if return_perturbed else 2
    budget = _vmem_budget_bytes()
    tile_r = _pick_tile_rows(rows, cols, dt.itemsize, n_streams, budget)
    grid = (pl.cdiv(rows, tile_r),)

    block = pl.BlockSpec((tile_r, cols), lambda i: (i, 0))
    out_shape = [jax.ShapeDtypeStruct((rows, cols), dt)]
    out_specs = [block]
    if return_perturbed:
        out_shape.append(jax.ShapeDtypeStruct((rows, cols), dt))
        out_specs.append(block)

    kernel = functools.partial(_perturb_kernel, n_sel=n_sel,
                               compute_xp=return_perturbed)
    return pl.pallas_call(
        kernel,
        grid=grid,
        out_shape=tuple(out_shape),
        in_specs=[
            pl.BlockSpec(memory_space=pltpu.MemorySpace.SMEM),  # packed scalars
            block,                                              # image tile
        ],
        out_specs=tuple(out_specs),
        input_output_aliases=({1: 0} if donate_x else {}),
        compiler_params=pltpu.CompilerParams(
            dimension_semantics=("parallel",),
            vmem_limit_bytes=budget),
    )(scal, x2d)


def _xla_forward(xflat, scal, n_sel, return_perturbed):
    """Plain-XLA path for tiny ragged tails (< 128 elements)."""
    x = xflat.astype(jnp.float32)
    base = jnp.clip((x * 0.5 + 0.5) * scal[1] + scal[2], 0.0, 1.0)
    outs = [(base * 2.0 - 1.0).astype(xflat.dtype)]
    if return_perturbed:
        w = scal[0]
        xp = base
        for k in range(n_sel):
            xc = jnp.clip(xp * scal[3 + 2 * k] + scal[4 + 2 * k], 0.0, 1.0)
            xp = w * xc + (1.0 - w) * xp
        outs.append(xp.astype(xflat.dtype))
    return outs


# ---------------------------------------------------------------------------
# Public forward
# ---------------------------------------------------------------------------
def image_perturbator_forward(x, base_params, opt_params, perturb_idxs,
                              perturb_w=1.0, return_perturbed=False,
                              donate_x=False):
    """Pallas implementation of ImagePerturbator.forward.

    x:            (N, C, H, W) float in [-1, 1]   (NCHW, like PyTorch)
    base_params:  (2,)  [scale, bias] of the synthetic base_perturb
    opt_params:   (P, 2) affine params of the opt_perturbs bank
    perturb_idxs: python list of ints (selected perturbation indices)
    return_perturbed: also compute/return the lerp-chained x_perturbed (the
                      PyTorch forward computes but discards it).
    donate_x:     alias the input buffer to the primary output
                  (input_output_aliases) when the caller can donate x.
    """
    if isinstance(perturb_w, (int, float)):       # skip for traced values
        assert 0.0 <= perturb_w <= 1.0, f"Invalid perturb_w: {perturb_w}"
    N, C, H, W = x.shape
    total = N * C * H * W
    dt = x.dtype

    # ---- scalar parameters, packed into one flat SMEM array ----------------
    n_sel = len(perturb_idxs)
    pieces = [jnp.asarray([perturb_w], jnp.float32),
              jnp.asarray(base_params, jnp.float32).reshape(2)]
    if n_sel:
        sel = jnp.asarray(opt_params, jnp.float32)[
            jnp.asarray(perturb_idxs, dtype=jnp.int32)]
        pieces.append(sel.reshape(-1))
    scal = jnp.concatenate(pieces)

    # ---- pad-free lane-dense 2D view of the image --------------------------
    view = _pick_2d_view(total)
    if view is not None:
        rows, cols = view
        x2d = x.reshape(rows, cols)          # contiguous reshape: no HBM pass
        results = _run_pallas_2d(scal, x2d, n_sel, return_perturbed, donate_x)
        outs = [r.reshape(N, C, H, W) for r in results]
    else:
        # TODO(synk): totals that are not a multiple of 128 (never the case
        # for standard image tensors) take the prefix+tail path: Pallas on the
        # 128-aligned prefix, plain XLA on the <128-element tail; the prefix
        # slice / concat may still cost XLA copies, unlike the fast path.
        aligned = (total // 128) * 128
        flat = x.reshape(-1)
        if aligned == 0:
            outs_flat = _xla_forward(flat, scal, n_sel, return_perturbed)
        else:
            rows, cols = _pick_2d_view(aligned)
            head2d = flat[:aligned].reshape(rows, cols)
            head = _run_pallas_2d(scal, head2d, n_sel, return_perturbed, False)
            tail = _xla_forward(flat[aligned:], scal, n_sel, return_perturbed)
            outs_flat = [jnp.concatenate([h.reshape(-1), t])
                         for h, t in zip(head, tail)]
        outs = [o.reshape(N, C, H, W) for o in outs_flat]

    if return_perturbed:
        return outs[0], outs[1]
    return outs[0]


# ---------------------------------------------------------------------------
# Pure-JAX reference mirroring the PyTorch forward exactly
# ---------------------------------------------------------------------------
def _ref_forward(x, base_params, opt_params, perturb_idxs, perturb_w):
    x01 = x.astype(jnp.float32) * 0.5 + 0.5
    xb = jnp.clip(x01 * base_params[0] + base_params[1], 0.0, 1.0)
    xp = xb                                   # x_perturbed = x * 1.0
    for idx in perturb_idxs:
        xc = jnp.clip(xp * opt_params[idx, 0] + opt_params[idx, 1], 0.0, 1.0)
        xp = perturb_w * xc + (1.0 - perturb_w) * xp
    return xb * 2.0 - 1.0, xp                 # module returns the first value


if __name__ == "__main__":
    key = jax.random.PRNGKey(0)
    x = jax.random.uniform(key, (2, 4, 16, 16),
                           minval=-1.0, maxval=1.0, dtype=jnp.float32)

    # Deterministic synthetic "perturbation" parameters (affine + clamp).
    base_params = jnp.array([1.1, -0.05], dtype=jnp.float32)     # base_perturb
    opt_params = jnp.array([[0.9, 0.05],                         # opt_perturbs[0]
                            [1.2, -0.10],                        # opt_perturbs[1]
                            [0.8, 0.15]], dtype=jnp.float32)     # opt_perturbs[2]

    # TODO(synk): torch.multinomial index sampling (random_perturb_idxs) has
    # no in-kernel equivalent; indices are chosen host-side and passed in,
    # exactly as the PyTorch forward() permits via its perturb_idxs argument.
    perturb_idxs = [2, 0]
    perturb_w = 0.7

    # Production path: the module returns only the base-perturbed image.
    out = image_perturbator_forward(x, base_params, opt_params,
                                    perturb_idxs, perturb_w)
    out = jax.block_until_ready(out)

    # Optional path exercising the full lerp chain (discarded by the module).
    out2, x_perturbed = image_perturbator_forward(
        x, base_params, opt_params, perturb_idxs, perturb_w,
        return_perturbed=True)
    jax.block_until_ready(x_perturbed)

    ref_out, ref_xp = _ref_forward(x, base_params, opt_params,
                                   perturb_idxs, perturb_w)
    assert jnp.allclose(out, ref_out, atol=1e-5, rtol=1e-5)
    assert jnp.allclose(out2, ref_out, atol=1e-5, rtol=1e-5)
    assert jnp.allclose(x_perturbed, ref_xp, atol=1e-5, rtol=1e-5)

    # Ragged row count (rows % 8 != 0) -> cdiv grid + boundary block path.
    x_r = jax.random.uniform(jax.random.PRNGKey(1), (2, 3, 56, 56),
                             minval=-1.0, maxval=1.0, dtype=jnp.float32)
    out_r = image_perturbator_forward(x_r, base_params, opt_params,
                                      perturb_idxs, perturb_w)
    ref_r, _ = _ref_forward(x_r, base_params, opt_params, perturb_idxs, perturb_w)
    assert jnp.allclose(jax.block_until_ready(out_r), ref_r, atol=1e-5, rtol=1e-5)

    # bf16 input exercises the dtype-aware (packed-sublane) tile picker.
    x_bf = x.astype(jnp.bfloat16)
    out_bf = image_perturbator_forward(x_bf, base_params, opt_params,
                                       perturb_idxs, perturb_w)
    ref_bf, _ = _ref_forward(x_bf, base_params, opt_params,
                             perturb_idxs, perturb_w)
    assert jnp.allclose(jax.block_until_ready(out_bf).astype(jnp.float32),
                        ref_bf, atol=2e-2, rtol=2e-2)

    # Ragged total (not a multiple of 128): prefix (Pallas) + tail (XLA) path.
    x_t = jax.random.uniform(jax.random.PRNGKey(2), (1, 3, 9, 9),
                             minval=-1.0, maxval=1.0, dtype=jnp.float32)
    out_t = image_perturbator_forward(x_t, base_params, opt_params,
                                      perturb_idxs, perturb_w)
    ref_t, _ = _ref_forward(x_t, base_params, opt_params, perturb_idxs, perturb_w)
    assert jnp.allclose(jax.block_until_ready(out_t), ref_t, atol=1e-5, rtol=1e-5)

    # Donated-input path (input_output_aliases={1: 0}) on a throwaway copy.
    x_d = x + 0.0
    out_d = image_perturbator_forward(x_d, base_params, opt_params,
                                      perturb_idxs, perturb_w, donate_x=True)
    assert jnp.allclose(jax.block_until_ready(out_d), ref_out,
                        atol=1e-5, rtol=1e-5)

    print("KERNEL_OK")
</pallas_src>

<mosaic_0001>
module attributes {stable_mosaic.version = 11 : i64} {
  func.func @_perturb_kernel(%arg0: i32, %arg1: memref<7xf32, #tpu.memory_space<smem>>, %arg2: memref<1x2048xf32, #tpu.memory_space<vmem>>, %arg3: memref<1x2048xf32, #tpu.memory_space<vmem>>) attributes {dimension_semantics = [#tpu.dimension_semantics<parallel>], iteration_bounds = array<i64: 1>, scalar_prefetch = 0 : i64, scratch_operands = 0 : i64, tpu.core_type = #tpu.core_type<tc>, window_params = [{transform_indices = @transform_0, window_bounds = array<i64: 7>}, {transform_indices = @transform_1, window_bounds = array<i64: 1, 2048>}, {transform_indices = @transform_2, window_bounds = array<i64: 1, 2048>}]} {
    %c0 = arith.constant 0 : index
    %c0_0 = arith.constant 0 : index
    %0 = vector.load %arg2[%c0, %c0_0] : memref<1x2048xf32, #tpu.memory_space<vmem>>, vector<1x2048xf32>
    %cst = arith.constant 5.000000e-01 : f32
    %1 = vector.broadcast %cst : f32 to vector<1x2048xf32>
    %2 = arith.mulf %0, %1 : vector<1x2048xf32>
    %cst_1 = arith.constant 5.000000e-01 : f32
    %3 = vector.broadcast %cst_1 : f32 to vector<1x2048xf32>
    %4 = arith.addf %2, %3 : vector<1x2048xf32>
    %c1 = arith.constant 1 : index
    %5 = memref.load %arg1[%c1] : memref<7xf32, #tpu.memory_space<smem>>
    %6 = vector.broadcast %5 : f32 to vector<1x2048xf32>
    %7 = arith.mulf %4, %6 : vector<1x2048xf32>
    %c2 = arith.constant 2 : index
    %8 = memref.load %arg1[%c2] : memref<7xf32, #tpu.memory_space<smem>>
    %9 = vector.broadcast %8 : f32 to vector<1x2048xf32>
    %10 = arith.addf %7, %9 : vector<1x2048xf32>
    %cst_2 = arith.constant 0.000000e+00 : f32
    %cst_3 = arith.constant 1.000000e+00 : f32
    %11 = vector.broadcast %cst_2 : f32 to vector<1x2048xf32>
    %12 = arith.maximumf %11, %10 : vector<1x2048xf32>
    %13 = vector.broadcast %cst_3 : f32 to vector<1x2048xf32>
    %14 = arith.minimumf %13, %12 : vector<1x2048xf32>
    %cst_4 = arith.constant 2.000000e+00 : f32
    %15 = vector.broadcast %cst_4 : f32 to vector<1x2048xf32>
    %16 = arith.mulf %14, %15 : vector<1x2048xf32>
    %cst_5 = arith.constant 1.000000e+00 : f32
    %17 = vector.broadcast %cst_5 : f32 to vector<1x2048xf32>
    %18 = arith.subf %16, %17 : vector<1x2048xf32>
    %c0_6 = arith.constant 0 : index
    %c0_7 = arith.constant 0 : index
    %19 = vector.load %arg3[%c0_6, %c0_7] : memref<1x2048xf32, #tpu.memory_space<vmem>>, vector<1x2048xf32>
    tpu.vector_store %arg3[%c0_6, %c0_7], %18 {strides = array<i32>} : memref<1x2048xf32, #tpu.memory_space<vmem>>, vector<1x2048xf32>,
    return
  }
  func.func @transform_0(%arg0: i32) -> i32 {
    %c0_i32 = arith.constant 0 : i32
    %c0_i32_0 = arith.constant 0 : i32
    return %c0_i32 : i32
  }
  func.func @transform_1(%arg0: i32) -> (i32, i32) {
    %c0_i32 = arith.constant 0 : i32
    %c0_i32_0 = arith.constant 0 : i32
    return %arg0, %c0_i32 : i32, i32
  }
  func.func @transform_2(%arg0: i32) -> (i32, i32) {
    %c0_i32 = arith.constant 0 : i32
    %c0_i32_0 = arith.constant 0 : i32
    return %arg0, %c0_i32 : i32, i32
  }
}

</mosaic_0001>

<bundles_post_ra>
// kernel: tpu_custom_call.1
= control target key start
LH: loop header
LB: loop body
LE: loop exit
PB: predicated region body
PF: predicated region fallthrough
CT: control target
= control target key end

     0   :  { %7 = vsyncpa [#allocation5], 0  ;;  %s181_s0 = inlined_call_operand.hbm [shape: f32[7], index: 0, kind: input, shape index: {}]   ;;  %s182_s1 = inlined_call_operand.hbm [shape: f32[1,2048], index: 1, kind: input, shape index: {}]   ;;  %s183_s2 = inlined_call_operand.hbm [shape: f32[1,2048], index: 2, kind: output, shape index: {}]  }
   0x1   :  { %8 = vsyncpa [#allocation3], 0 }
   0x2   :  { %9 = vsyncpa [#allocation4], 0  ;;  %s15_s11 = sshll.u32 %s181_s0, 4  ;;  %s24_s14 = sshll.u32 %s182_s1, 4  ;;  %s16_s11 = int_to_ptr.hbm [resolvable:$true] %s15_s11  ;;  %s25_s14 = int_to_ptr.hbm [resolvable:$true] %s24_s14 }
   0x3   :  { %s154_s15 = smov [#allocation2]   ;;  %s155_s16 = smov [#allocation6]  }
   0x4   :  { %18 = dma.hbm_to_smem %s16_s11, 16, %s154_s15, [#allocation5]  }
   0x5   :  { %s26_s17 = sshll.u32 %s155_s16, 4  ;;  %s27_s17 = int_to_ptr.vmem [resolvable:$true] %s26_s17 }
   0x6   :  { %29 = dma.hbm_to_vmem [thread:$0]  %s25_s14, 256, %s27_s17, [#allocation3]  }
   0x7   :  { %148 = dma.done.wait [#allocation5], 16  }
   0x8   :  { %149 = vsyncadd [#allocation5], 4294967280 }
   0x9   :  { %150 = dma.done.wait [#allocation3], 256  }
   0xa   :  { %151 = vsyncadd [#allocation3], 4294967040 }
   0xb   :  { %38 = sfence }
   0xc   :  { %v39_v0 = vld [vmem:[#allocation6] sm:$0xff]  ;;  %s81_s18 = sld [smem:[#allocation2 + $0x1]]  ;;  %v40_v1 = vld [vmem:[#allocation6 + $0x8] sm:$0xff]  ;;  %s156_s1 = smov [#allocation7]  }
   0xd   :  { %v41_v2 = vmul.f32 0.5, %v39_v0  ;;  %s82_s0 = sld [smem:[#allocation2 + $0x2]]  ;;  %v42_v3 = vmul.f32 0.5, %v40_v1  ;;  %s68_s19 = sshll.u32 %s156_s1, 4  ;;  %s69_s19 = int_to_ptr.vmem [resolvable:$true] %s68_s19 }
   0xe   :  { %s70_s22 = sshll.u32 %s183_s2, 4  ;;  %s71_s22 = int_to_ptr.hbm [resolvable:$true] %s70_s22 }
   0xf   :  { %v43_v4 = vadd.f32 0.5, %v41_v2  ;;  %v44_v5 = vadd.f32 0.5, %v42_v3 }
  0x12   :  { %v46_v6 = vstv %s81_s18 }
  0x13   :  { %v47_v7 = vmul.f32 %v46_v6, %v43_v4  ;;  %v50_v8 = vstv %s82_s0  ;;  %v48_v9 = vmul.f32 %v46_v6, %v44_v5 }
  0x15   :  { %v51_v10 = vadd.f32 %v50_v8, %v47_v7  ;;  %v52_v11 = vadd.f32 %v50_v8, %v48_v9 }
  0x17   :  { %v53_v12 = vmax.f32 %v51_v10, 0.0  ;;  %v54_v13 = vmax.f32 %v52_v11, 0.0 }
  0x19   :  { %v55_v14 = vmin.f32 %v53_v12, 1.0  ;;  %v56_v15 = vmin.f32 %v54_v13, 1.0 }
  0x1b   :  { %v57_v16 = vmul.f32 2.0, %v55_v14  ;;  %v58_v17 = vmul.f32 2.0, %v56_v15 }
  0x1d   :  { %v83_v18 = vadd.f32 -1.0, %v57_v16  ;;  %v84_v19 = vadd.f32 -1.0, %v58_v17 }
  0x1f   :  { %61 = vst [vmem:[#allocation7] sm:$0xff] %v83_v18 }
  0x20   :  { %62 = vst [vmem:[#allocation7 + $0x8] sm:$0xff] %v84_v19 }
  0x21   :  { %73 = dma.vmem_to_hbm [thread:$0]  %s69_s19, 256, %s71_s22, [#allocation4]  }
  0x22   :  { %152 = dma.done.wait [#allocation4], 256  }
  0x23   :  { %153 = vsyncadd [#allocation4], 4294967040 }
  0x24   :  { %78 = vsyncpa [#allocation3], 1 }
  0x25   :  { %79 = vsyncpa [#allocation4], 1 }
  0x26   :  { %80 = vsyncpa [#allocation5], 1 }

</bundles_post_ra>
